<compile_context>
chip_gen: v5e
topology: v5e:2x2
jax: 0.10.0
libtpu: 0.0.40
codegen_flags: <defaults>
</compile_context>

<pallas_src>
import jax
import jax.numpy as jnp
from jax.experimental import pallas as pl
from jax.experimental.pallas import tpu as pltpu

_SMALL_BYTES = 256 * 1024
_TARGET_BLOCK_BYTES = 4 * 1024 * 1024        # good for v5e/v6e/v7x with 32 MiB VMEM limit
_VMEM_LIMIT_BYTES = 32 * 1024 * 1024
_SUBLANE_MIN = {4: 8, 2: 16, 1: 32}          # itemsize -> native sublane tile


def _scale_kernel(x_ref, coef_ref, o_ref):
    # coef stays f32; compute in f32 and cast only at the store so bf16/f16
    # inputs don't lose precision through coefficient values near 1.0.
    o_ref[...] = (x_ref[...].astype(jnp.float32) * coef_ref[...]).astype(o_ref.dtype)


def _divisors(n):
    small, large = [], []
    d = 1
    while d * d <= n:
        if n % d == 0:
            small.append(d)
            if d != n // d:
                large.append(n // d)
        d += 1
    return small + large[::-1]


def _choose_lane_reps(rows_full, w, itemsize, max_lane=8192):
    """Pick reps so lane = w*reps is a multiple of 128 (unmasked lane-dense
    stores), reps divides rows_full exactly (no padding ever), lane <= max_lane,
    preferring choices that leave enough rows for >= 4 row tiles."""
    if rows_full == 0:
        return 1
    sublane_min = _SUBLANE_MIN.get(itemsize, 8)
    lane_cap = max(max_lane, w)  # reps=1 is always admissible when w % 128 == 0
    candidates = [r for r in _divisors(rows_full)
                  if (w * r) % 128 == 0 and w * r <= lane_cap]
    if not candidates:
        # TODO(synk): when no divisor of rows_full yields a 128-multiple lane
        # (e.g. W < 128 with an awkward row count), we fall back to lane = W;
        # stores become masked (vst.msk) but we avoid full-array pad/slice copies.
        return 1
    for min_rows in (4 * sublane_min, sublane_min, 1):
        tier = [r for r in candidates if rows_full // r >= min_rows]
        if tier:
            return max(tier)   # widest lane within the best tier
    return 1


def gaussian_noise(x, noise, *, sigma=0.1, training=True, is_relative_detach=True,
                   force_pallas=False, donate_input=False):
    """JAX/Pallas equivalent of GaussianNoise.forward.

    x:     array whose trailing dim equals noise.shape[0]
    noise: (W,) float array, pre-sampled standard normal (== self.noise.normal_())
    sigma: must be a static Python number (not a traced value).
    """
    del is_relative_detach      # detach only affects gradients, not the forward value
    sigma = float(sigma)        # guards against a traced sigma (must be static)
    if not training or sigma == 0.0:
        return x

    orig_shape = x.shape
    w = orig_shape[-1]
    assert noise.shape == (w,), "noise must match the trailing dim of x"
    if x.size == 0:
        return x

    itemsize = jnp.dtype(x.dtype).itemsize
    coef_1d = (1.0 + sigma * noise.astype(jnp.float32))  # (w,), kept in f32

    # ---- small-size bypass: fixed pallas_call/DMA overhead dominates below this ----
    if not force_pallas and x.size * itemsize < _SMALL_BYTES:
        coef_b = coef_1d.reshape((1,) * (x.ndim - 1) + (w,))
        return (x.astype(jnp.float32) * coef_b).astype(x.dtype)

    # ---- lane-dense reshape: last dim a multiple of 128, reps divides rows ----
    total = x.size
    rows_full = total // w
    reps = _choose_lane_reps(rows_full, w, itemsize)
    lane = w * reps
    rows = rows_full // reps
    x2 = x.reshape(rows, lane)
    coef = jnp.tile(coef_1d, reps).reshape(1, lane)      # resident f32 row

    # ---- row tile: ~4 MiB blocks, dtype-aware sublane rounding, >= 4 steps ----
    sublane_min = _SUBLANE_MIN.get(itemsize, 8)
    if rows <= sublane_min:
        tm = rows                                        # full extent on the row axis
    else:
        tm = min(rows, max(sublane_min, _TARGET_BLOCK_BYTES // (lane * itemsize)))
        tm = max(sublane_min, (tm // sublane_min) * sublane_min)
        if rows >= 4 * sublane_min:
            # cap so there are >= 4 grid steps (>= 2 per v7x TensorCore)
            cap = max(sublane_min, ((rows // 4) // sublane_min) * sublane_min)
            tm = min(tm, cap)

    # Ragged tail handled by Pallas: partial last block is padded on read and
    # masked on write -- no wrapper-side pad/slice copies.
    grid_rows = pl.cdiv(rows, tm)

    extra = {}
    if donate_input:
        extra["input_output_aliases"] = {0: 0}           # reuse x2's buffer for out

    out2 = pl.pallas_call(
        _scale_kernel,
        out_shape=jax.ShapeDtypeStruct((rows, lane), x.dtype),
        grid=(grid_rows,),
        in_specs=[
            pl.BlockSpec((tm, lane), lambda i: (i, 0)),
            pl.BlockSpec((1, lane), lambda i: (0, 0)),   # constant -> stays resident
        ],
        out_specs=pl.BlockSpec((tm, lane), lambda i: (i, 0)),
        compiler_params=pltpu.CompilerParams(
            dimension_semantics=("parallel",),
            vmem_limit_bytes=_VMEM_LIMIT_BYTES,
        ),
        **extra,
    )(x2, coef)

    return out2.reshape(orig_shape)


def _reference(x, noise, sigma):
    # Pure-JAX reference of the PyTorch forward: x + noise * (sigma * x), f32 math.
    w = noise.shape[0]
    xf = x.astype(jnp.float32)
    nf = noise.astype(jnp.float32).reshape((1,) * (x.ndim - 1) + (w,))
    return (xf + nf * (sigma * xf)).astype(x.dtype)


if __name__ == "__main__":
    key = jax.random.PRNGKey(0)
    kx, kn, kx2, kx3 = jax.random.split(key, 4)

    sigma = 0.1
    W = 16
    noise = jax.random.normal(kn, (W,), dtype=jnp.float32)  # stand-in for noise.normal_()

    # 1) main demo shape, f32, forced through the Pallas kernel
    x = jax.random.normal(kx, (2, 4, 16, 16), dtype=jnp.float32)
    out = jax.block_until_ready(gaussian_noise(x, noise, sigma=sigma, training=True,
                                               force_pallas=True))
    ref = _reference(x, noise, sigma)
    assert out.shape == x.shape and out.dtype == x.dtype
    assert jnp.allclose(out, ref, rtol=1e-5, atol=1e-6), float(jnp.max(jnp.abs(out - ref)))

    # 2) ragged row count -> exercises the masked partial last block (no pad/slice)
    xr = jax.random.normal(kx2, (3, 5, 8, 16), dtype=jnp.float32)
    outr = jax.block_until_ready(gaussian_noise(xr, noise, sigma=sigma, training=True,
                                                force_pallas=True))
    refr = _reference(xr, noise, sigma)
    assert jnp.allclose(outr, refr, rtol=1e-5, atol=1e-6)

    # 3) bf16 input: f32 compute path inside the kernel keeps precision
    xb = jax.random.normal(kx3, (2, 4, 16, 16), dtype=jnp.bfloat16)
    outb = jax.block_until_ready(gaussian_noise(xb, noise, sigma=sigma, training=True,
                                                force_pallas=True))
    refb = _reference(xb, noise, sigma)
    assert outb.dtype == jnp.bfloat16
    assert jnp.allclose(outb.astype(jnp.float32), refb.astype(jnp.float32),
                        rtol=1e-2, atol=1e-2)

    # 4) small-size auto bypass (XLA path) matches too
    outs = jax.block_until_ready(gaussian_noise(x, noise, sigma=sigma, training=True))
    assert jnp.allclose(outs, ref, rtol=1e-5, atol=1e-6)

    # 5) eval-mode / sigma==0 paths return the input unchanged
    assert jnp.array_equal(gaussian_noise(x, noise, sigma=sigma, training=False), x)
    assert jnp.array_equal(gaussian_noise(x, noise, sigma=0.0, training=True), x)

    print("KERNEL_OK")
</pallas_src>

<mosaic_0001>
module attributes {stable_mosaic.version = 11 : i64} {
  func.func @_scale_kernel(%arg0: i32, %arg1: memref<8x256xf32, #tpu.memory_space<vmem>>, %arg2: memref<1x256xf32, #tpu.memory_space<vmem>>, %arg3: memref<8x256xf32, #tpu.memory_space<vmem>>) attributes {dimension_semantics = [#tpu.dimension_semantics<parallel>], iteration_bounds = array<i64: 1>, scalar_prefetch = 0 : i64, scratch_operands = 0 : i64, tpu.core_type = #tpu.core_type<tc>, window_params = [{transform_indices = @transform_0, window_bounds = array<i64: 8, 256>}, {pipeline_mode = #tpu.pipeline_mode<synchronous>, transform_indices = @transform_1, window_bounds = array<i64: 1, 256>}, {transform_indices = @transform_2, window_bounds = array<i64: 8, 256>}]} {
    %c0 = arith.constant 0 : index
    %c0_0 = arith.constant 0 : index
    %0 = vector.load %arg1[%c0, %c0_0] : memref<8x256xf32, #tpu.memory_space<vmem>>, vector<8x256xf32>
    %c0_1 = arith.constant 0 : index
    %c0_2 = arith.constant 0 : index
    %1 = vector.load %arg2[%c0_1, %c0_2] : memref<1x256xf32, #tpu.memory_space<vmem>>, vector<1x256xf32>
    %2 = vector.broadcast %1 : vector<1x256xf32> to vector<8x256xf32>
    %3 = arith.mulf %0, %2 : vector<8x256xf32>
    %c0_3 = arith.constant 0 : index
    %c0_4 = arith.constant 0 : index
    %4 = vector.load %arg3[%c0_3, %c0_4] : memref<8x256xf32, #tpu.memory_space<vmem>>, vector<8x256xf32>
    tpu.vector_store %arg3[%c0_3, %c0_4], %3 {strides = array<i32>} : memref<8x256xf32, #tpu.memory_space<vmem>>, vector<8x256xf32>,
    return
  }
  func.func @transform_0(%arg0: i32) -> (i32, i32) {
    %c0_i32 = arith.constant 0 : i32
    %c0_i32_0 = arith.constant 0 : i32
    return %arg0, %c0_i32 : i32, i32
  }
  func.func @transform_1(%arg0: i32) -> (i32, i32) {
    %c0_i32 = arith.constant 0 : i32
    %c0_i32_0 = arith.constant 0 : i32
    %c0_i32_1 = arith.constant 0 : i32
    return %c0_i32, %c0_i32_0 : i32, i32
  }
  func.func @transform_2(%arg0: i32) -> (i32, i32) {
    %c0_i32 = arith.constant 0 : i32
    %c0_i32_0 = arith.constant 0 : i32
    return %arg0, %c0_i32 : i32, i32
  }
}

</mosaic_0001>

<bundles_post_ra>
// kernel: tpu_custom_call.1
= control target key start
LH: loop header
LB: loop body
LE: loop exit
PB: predicated region body
PF: predicated region fallthrough
CT: control target
= control target key end

     0   :  { %7 = vsyncpa [#allocation3], 0  ;;  %s178_s0 = inlined_call_operand.hbm [shape: f32[8,256], index: 0, kind: input, shape index: {}]   ;;  %s179_s1 = inlined_call_operand.hbm [shape: f32[1,256], index: 1, kind: input, shape index: {}]   ;;  %s180_s2 = inlined_call_operand.hbm [shape: f32[8,256], index: 2, kind: output, shape index: {}]  }
   0x1   :  { %8 = vsyncpa [#allocation6], 0 }
   0x2   :  { %9 = vsyncpa [#allocation4], 0  ;;  %s15_s11 = sshll.u32 %s178_s0, 4  ;;  %s151_s12 = smov [#allocation2]   ;;  %s16_s11 = int_to_ptr.hbm [resolvable:$true] %s15_s11 }
   0x3   :  { %s17_s13 = sshll.u32 %s151_s12, 4  ;;  %s26_s16 = sshll.u32 %s179_s1, 4  ;;  %s18_s13 = int_to_ptr.vmem [resolvable:$true] %s17_s13  ;;  %s27_s16 = int_to_ptr.hbm [resolvable:$true] %s26_s16 }
   0x4   :  { %20 = dma.hbm_to_vmem [thread:$0]  %s16_s11, 256, %s18_s13, [#allocation3]  }
   0x5   :  { %s152_s17 = smov [#allocation5]  }
   0x6   :  { %s28_s18 = sshll.u32 %s152_s17, 4  ;;  %s29_s18 = int_to_ptr.vmem [resolvable:$true] %s28_s18 }
   0x7   :  { %31 = dma.hbm_to_vmem [thread:$0]  %s27_s16, 32, %s29_s18, [#allocation6]  }
   0x8   :  { %145 = dma.done.wait [#allocation3], 256  }
   0x9   :  { %146 = vsyncadd [#allocation3], 4294967040 }
   0xa   :  { %147 = dma.done.wait [#allocation6], 32  }
   0xb   :  { %148 = vsyncadd [#allocation6], 4294967264  ;;  %v40_v0 = vld [vmem:[#allocation2] sm:$0xff]  ;;  %v42_v1 = vld [vmem:[#allocation5] sm:$0x3]  ;;  %s153_s0 = smov [#allocation7]  }
   0xc   :  { %v41_v2 = vld [vmem:[#allocation2 + $0x8] sm:$0xff]  ;;  %v44_v3 = vperm.slane %v42_v1, 0  ;;  %v45_v4 = vperm.slane %v42_v1, 1  ;;  %s57_s19 = sshll.u32 %s153_s0, 4  ;;  %s59_s1 = sshll.u32 %s180_s2, 4  ;;  %s58_s19 = int_to_ptr.vmem [resolvable:$true] %s57_s19  ;;  %s60_s1 = int_to_ptr.hbm [resolvable:$true] %s59_s1 }
   0xe   :  { %v48_v5 = vmul.f32 %v44_v3, %v40_v0  ;;  %v49_v6 = vmul.f32 %v45_v4, %v41_v2 }
  0x10   :  { %50 = vst [vmem:[#allocation7] sm:$0xff] %v48_v5 }
  0x11   :  { %51 = vst [vmem:[#allocation7 + $0x8] sm:$0xff] %v49_v6 }
  0x12   :  { %62 = dma.vmem_to_hbm [thread:$0]  %s58_s19, 256, %s60_s1, [#allocation4]  }
  0x13   :  { %149 = dma.done.wait [#allocation4], 256  }
  0x14   :  { %150 = vsyncadd [#allocation4], 4294967040 }
  0x15   :  { %67 = vsyncpa [#allocation3], 1 }
  0x16   :  { %68 = vsyncpa [#allocation6], 1 }
  0x17   :  { %69 = vsyncpa [#allocation4], 1 }

</bundles_post_ra>
